<compile_context>
chip_gen: v6e
topology: v6e:2x2x1
jax: 0.10.0
libtpu: 0.0.40
codegen_flags: <defaults>
</compile_context>

<pallas_src>
import numpy as np
import jax
import jax.numpy as jnp
from jax import lax
from jax.experimental import pallas as pl
from jax.experimental.pallas import tpu as pltpu


# ----------------------------------------------------------------------------
# Host-side (trace-time) constant construction
# ----------------------------------------------------------------------------
def _bilinear_matrix(in_size, out_size):
    """Row-interpolation matrix matching nn.Upsample(mode='bilinear',
    align_corners=False): out = R @ in  (R: (out_size, in_size))."""
    scale = in_size / out_size
    R = np.zeros((out_size, in_size), np.float32)
    for d in range(out_size):
        src = (d + 0.5) * scale - 0.5
        if src < 0.0:
            src = 0.0
        i0 = min(int(np.floor(src)), in_size - 1)
        i1 = min(i0 + 1, in_size - 1)
        lam = np.float32(src - i0)
        R[d, i0] += np.float32(1.0) - lam
        R[d, i1] += lam
    return R


def _upsample_conv_tap_matrix(h_in, w_in, s, k, pad):
    """Folds bilinear upsample (h_in,w_in)->(s,s) and the k*k conv tap shifts
    (zero padded) into one matrix of shape (h_in*w_in, k*k*s_out*s_out)."""
    Rh = _bilinear_matrix(h_in, s)
    Rw = _bilinear_matrix(w_in, s)
    s_out = s + 2 * pad - k + 1
    ss_up, ss_out = s * s, s_out * s_out
    # M[q, p]: q = y*w_in + x (input pixel), p = sh*s + sw (upsampled pixel)
    M = np.einsum('sy,tx->yxst', Rh, Rw).reshape(h_in * w_in, ss_up)
    M = M.astype(np.float32)
    taps = []
    for dy in range(k):
        for dx in range(k):
            G = np.zeros((ss_up, ss_out), np.float32)
            for h in range(s_out):
                for w in range(s_out):
                    hh, ww = h - pad + dy, w - pad + dx
                    if 0 <= hh < s and 0 <= ww < s:
                        G[hh * s + ww, h * s_out + w] = 1.0
            taps.append(M @ G)
    return np.concatenate(taps, axis=1), s_out


# ----------------------------------------------------------------------------
# Fused kernel: one batch sample per grid step
# ----------------------------------------------------------------------------
def _stylegan_block_kernel(x_ref, mt_ref, cw_ref, cb_ref, nw_ref, noise_ref,
                           w_ref, ws_ref, bs_ref, wh_ref, bh_ref, o_ref):
    c_out, ss = o_ref.shape[1], o_ref.shape[2]
    n_taps = cw_ref.shape[0]

    x = x_ref[0]                                               # (C_in, Hin*Win)

    # Fused bilinear upsample + im2col of the conv taps: one lane-dense matmul.
    u = jnp.dot(x, mt_ref[...],
                preferred_element_type=jnp.float32)            # (C_in, n_taps*SS)

    # Conv2d: accumulate (C_out, C_in) @ (C_in, SS) per tap; slices are
    # lane-aligned (SS is a multiple of 128).
    y = jnp.zeros((c_out, ss), jnp.float32)
    for t in range(n_taps):
        y = y + jnp.dot(cw_ref[t], u[:, t * ss:(t + 1) * ss],
                        preferred_element_type=jnp.float32)
    y = y + cb_ref[...]                                        # + bias (C_out,1)

    # InjectNoise: (C_out,1) lane-broadcast weight x (1,SS) sublane-broadcast noise.
    y = y + nw_ref[...] * noise_ref[0]

    # LeakyReLU(0.2)
    y = jnp.maximum(y, 0.2 * y)

    # AdaIN: InstanceNorm2d (biased var, eps=1e-5) then style scale/shift.
    mean = jnp.mean(y, axis=-1, keepdims=True)                 # (C_out, 1)
    var = jnp.mean((y - mean) ** 2, axis=-1, keepdims=True)
    y_norm = (y - mean) * lax.rsqrt(var + 1e-5)

    # Linear(w_dim -> C_out) done as multiply + lane reduce (no transposes).
    w_row = w_ref[0]                                           # (1, w_dim)
    scale = jnp.sum(ws_ref[...] * w_row, axis=-1, keepdims=True) + bs_ref[...]
    shift = jnp.sum(wh_ref[...] * w_row, axis=-1, keepdims=True) + bh_ref[...]

    o_ref[0] = (scale * y_norm + shift).astype(o_ref.dtype)


# ----------------------------------------------------------------------------
# Wrapper
# ----------------------------------------------------------------------------
def micro_stylegan_generator_block(x, w, params, noise, *, starting_size,
                                   kernel_size=3, padding=1):
    """x: (N, C_in, H_in, W_in), w: (N, w_dim), noise: (N, 1, S_out, S_out)."""
    n, c_in, h_in, w_in = x.shape
    w_dim = w.shape[1]
    c_out = params['conv_w'].shape[0]
    k = kernel_size

    mt_np, s_out = _upsample_conv_tap_matrix(h_in, w_in, starting_size, k, padding)
    ss = s_out * s_out
    n_taps = k * k
    assert noise.shape == (n, 1, s_out, s_out)

    # Lane-dense flat layouts + (C,1) parameter columns.
    x_flat = x.reshape(n, c_in, h_in * w_in)
    noise_flat = noise.reshape(n, 1, ss)
    w3 = w.reshape(n, 1, w_dim)
    mt = jnp.asarray(mt_np)
    cw_taps = jnp.transpose(params['conv_w'], (2, 3, 0, 1)).reshape(n_taps, c_out, c_in)
    cb = params['conv_b'].reshape(c_out, 1)
    nw = params['noise_w'].reshape(c_out, 1)
    ws = params['style_scale_w']                      # (C_out, w_dim)
    bs = params['style_scale_b'].reshape(c_out, 1)
    wh = params['style_shift_w']
    bh = params['style_shift_b'].reshape(c_out, 1)

    out_flat = pl.pallas_call(
        _stylegan_block_kernel,
        out_shape=jax.ShapeDtypeStruct((n, c_out, ss), x.dtype),
        grid_spec=pltpu.PrefetchScalarGridSpec(
            num_scalar_prefetch=0,
            grid=(n,),
            in_specs=[
                pl.BlockSpec((1, c_in, h_in * w_in), lambda i: (i, 0, 0)),   # x
                pl.BlockSpec((h_in * w_in, n_taps * ss), lambda i: (0, 0)),  # fused upsample+tap matrix
                pl.BlockSpec((n_taps, c_out, c_in), lambda i: (0, 0, 0)),    # conv weight taps
                pl.BlockSpec((c_out, 1), lambda i: (0, 0)),                  # conv bias
                pl.BlockSpec((c_out, 1), lambda i: (0, 0)),                  # noise weight
                pl.BlockSpec((1, 1, ss), lambda i: (i, 0, 0)),               # noise
                pl.BlockSpec((1, 1, w_dim), lambda i: (i, 0, 0)),            # w vector
                pl.BlockSpec((c_out, w_dim), lambda i: (0, 0)),              # style scale W
                pl.BlockSpec((c_out, 1), lambda i: (0, 0)),                  # style scale b
                pl.BlockSpec((c_out, w_dim), lambda i: (0, 0)),              # style shift W
                pl.BlockSpec((c_out, 1), lambda i: (0, 0)),                  # style shift b
            ],
            out_specs=pl.BlockSpec((1, c_out, ss), lambda i: (i, 0, 0)),
        ),
        compiler_params=pltpu.CompilerParams(
            dimension_semantics=("parallel",),
            vmem_limit_bytes=32 * 1024 * 1024,
        ),
    )(x_flat, mt, cw_taps, cb, nw, noise_flat, w3, ws, bs, wh, bh)

    return out_flat.reshape(n, c_out, s_out, s_out)


# ----------------------------------------------------------------------------
if __name__ == "__main__":
    N, C_IN, C_OUT, W_DIM = 2, 4, 4, 8
    H_IN = W_IN = 8
    STARTING_SIZE = 16
    K = 3

    key = jax.random.PRNGKey(0)
    keys = jax.random.split(key, 10)
    x = jax.random.normal(keys[0], (N, C_IN, H_IN, W_IN), jnp.float32)
    w = jax.random.normal(keys[1], (N, W_DIM), jnp.float32)
    params = dict(
        conv_w=jax.random.normal(keys[2], (C_OUT, C_IN, K, K), jnp.float32) * 0.2,
        conv_b=jax.random.normal(keys[3], (C_OUT,), jnp.float32) * 0.1,
        noise_w=jax.random.normal(keys[4], (C_OUT,), jnp.float32),
        style_scale_w=jax.random.normal(keys[5], (C_OUT, W_DIM), jnp.float32) * 0.3,
        style_scale_b=jax.random.normal(keys[6], (C_OUT,), jnp.float32) * 0.1,
        style_shift_w=jax.random.normal(keys[7], (C_OUT, W_DIM), jnp.float32) * 0.3,
        style_shift_b=jax.random.normal(keys[8], (C_OUT,), jnp.float32) * 0.1,
    )
    S_OUT = STARTING_SIZE + 2 * 1 - K + 1
    # Fresh noise per forward pass, shape (N, 1, H, W) like torch.randn.
    noise = jax.random.normal(keys[9], (N, 1, S_OUT, S_OUT), jnp.float32)

    out = micro_stylegan_generator_block(
        x, w, params, noise, starting_size=STARTING_SIZE, kernel_size=K)
    out = jax.block_until_ready(out)

    # ---------------- pure-JAX reference ----------------
    Rh = jnp.asarray(_bilinear_matrix(H_IN, STARTING_SIZE))
    Rw = jnp.asarray(_bilinear_matrix(W_IN, STARTING_SIZE))
    x_up = jnp.einsum('sy,ncyx,tx->ncst', Rh, x, Rw,
                      precision=lax.Precision.HIGHEST)
    conv = lax.conv_general_dilated(
        x_up, params['conv_w'], (1, 1), ((1, 1), (1, 1)),
        dimension_numbers=('NCHW', 'OIHW', 'NCHW'),
        precision=lax.Precision.HIGHEST) + params['conv_b'][None, :, None, None]
    y = conv + params['noise_w'][None, :, None, None] * noise
    y = jnp.maximum(y, 0.2 * y)
    mean = y.mean(axis=(2, 3), keepdims=True)
    var = y.var(axis=(2, 3), keepdims=True)
    y_norm = (y - mean) / jnp.sqrt(var + 1e-5)
    scale = (jnp.einsum('nd,cd->nc', w, params['style_scale_w'],
                        precision=lax.Precision.HIGHEST)
             + params['style_scale_b'])[:, :, None, None]
    shift = (jnp.einsum('nd,cd->nc', w, params['style_shift_w'],
                        precision=lax.Precision.HIGHEST)
             + params['style_shift_b'])[:, :, None, None]
    ref = scale * y_norm + shift

    assert out.shape == (N, C_OUT, S_OUT, S_OUT)
    # Loose-ish tolerance: kernel uses MXU f32 matmuls (multi-pass) vs XLA
    # highest-precision conv/einsum; real semantic bugs would be O(1) off.
    max_err = jnp.max(jnp.abs(out - ref))
    assert jnp.allclose(out, ref, atol=2e-2, rtol=2e-2), f"max abs err {max_err}"
    print("KERNEL_OK")
</pallas_src>

<mosaic_0001>
module attributes {stable_mosaic.version = 11 : i64} {
  func.func @_stylegan_block_kernel(%arg0: i32, %arg1: memref<1x4x64xf32, #tpu.memory_space<vmem>>, %arg2: memref<64x2304xf32, #tpu.memory_space<vmem>>, %arg3: memref<9x4x4xf32, #tpu.memory_space<vmem>>, %arg4: memref<4x1xf32, #tpu.memory_space<vmem>>, %arg5: memref<4x1xf32, #tpu.memory_space<vmem>>, %arg6: memref<1x1x256xf32, #tpu.memory_space<vmem>>, %arg7: memref<1x1x8xf32, #tpu.memory_space<vmem>>, %arg8: memref<4x8xf32, #tpu.memory_space<vmem>>, %arg9: memref<4x1xf32, #tpu.memory_space<vmem>>, %arg10: memref<4x8xf32, #tpu.memory_space<vmem>>, %arg11: memref<4x1xf32, #tpu.memory_space<vmem>>, %arg12: memref<1x4x256xf32, #tpu.memory_space<vmem>>) attributes {dimension_semantics = [#tpu.dimension_semantics<parallel>], iteration_bounds = array<i64: 2>, scalar_prefetch = 0 : i64, scratch_operands = 0 : i64, tpu.core_type = #tpu.core_type<tc>, window_params = [{transform_indices = @transform_0, window_bounds = array<i64: 1, 4, 64>}, {pipeline_mode = #tpu.pipeline_mode<synchronous>, transform_indices = @transform_1, window_bounds = array<i64: 64, 2304>}, {pipeline_mode = #tpu.pipeline_mode<synchronous>, transform_indices = @transform_2, window_bounds = array<i64: 9, 4, 4>}, {pipeline_mode = #tpu.pipeline_mode<synchronous>, transform_indices = @transform_3, window_bounds = array<i64: 4, 1>}, {pipeline_mode = #tpu.pipeline_mode<synchronous>, transform_indices = @transform_4, window_bounds = array<i64: 4, 1>}, {transform_indices = @transform_5, window_bounds = array<i64: 1, 1, 256>}, {transform_indices = @transform_6, window_bounds = array<i64: 1, 1, 8>}, {pipeline_mode = #tpu.pipeline_mode<synchronous>, transform_indices = @transform_7, window_bounds = array<i64: 4, 8>}, {pipeline_mode = #tpu.pipeline_mode<synchronous>, transform_indices = @transform_8, window_bounds = array<i64: 4, 1>}, {pipeline_mode = #tpu.pipeline_mode<synchronous>, transform_indices = @transform_9, window_bounds = array<i64: 4, 8>}, {pipeline_mode = #tpu.pipeline_mode<synchronous>, transform_indices = @transform_10, window_bounds = array<i64: 4, 1>}, {transform_indices = @transform_11, window_bounds = array<i64: 1, 4, 256>}]} {
    %c0 = arith.constant 0 : index
    %c0_0 = arith.constant 0 : index
    %c0_1 = arith.constant 0 : index
    %0 = vector.load %arg1[%c0, %c0_0, %c0_1] : memref<1x4x64xf32, #tpu.memory_space<vmem>>, vector<1x4x64xf32>
    %1 = vector.shape_cast %0 : vector<1x4x64xf32> to vector<4x64xf32>
    %c0_2 = arith.constant 0 : index
    %c0_3 = arith.constant 0 : index
    %2 = vector.load %arg2[%c0_2, %c0_3] : memref<64x2304xf32, #tpu.memory_space<vmem>>, vector<64x2304xf32>
    %cst = arith.constant dense<0.000000e+00> : vector<4x2304xf32>
    %3 = tpu.matmul %1, %2, %cst {dimension_numbers = #tpu.dot_dimension_numbers<[1], [0], [0], [1], [0, 0, 1, 1], [], []>} : vector<4x64xf32>, vector<64x2304xf32>, vector<4x2304xf32> -> vector<4x2304xf32>
    %cst_4 = arith.constant 0.000000e+00 : f32
    %4 = vector.broadcast %cst_4 : f32 to vector<4x256xf32>
    %c0_5 = arith.constant 0 : index
    %c0_6 = arith.constant 0 : index
    %c0_7 = arith.constant 0 : index
    %5 = vector.load %arg3[%c0_5, %c0_6, %c0_7] : memref<9x4x4xf32, #tpu.memory_space<vmem>>, vector<1x4x4xf32>
    %6 = vector.shape_cast %5 : vector<1x4x4xf32> to vector<4x4xf32>
    %7 = vector.extract_strided_slice %3 {offsets = [0, 0], sizes = [4, 256], strides = [1, 1]} : vector<4x2304xf32> to vector<4x256xf32>
    %cst_8 = arith.constant dense<0.000000e+00> : vector<4x256xf32>
    %8 = tpu.matmul %6, %7, %cst_8 {dimension_numbers = #tpu.dot_dimension_numbers<[1], [0], [0], [1], [0, 0, 1, 1], [], []>} : vector<4x4xf32>, vector<4x256xf32>, vector<4x256xf32> -> vector<4x256xf32>
    %9 = arith.addf %4, %8 : vector<4x256xf32>
    %c1 = arith.constant 1 : index
    %c0_9 = arith.constant 0 : index
    %c0_10 = arith.constant 0 : index
    %10 = vector.load %arg3[%c1, %c0_9, %c0_10] : memref<9x4x4xf32, #tpu.memory_space<vmem>>, vector<1x4x4xf32>
    %11 = vector.shape_cast %10 : vector<1x4x4xf32> to vector<4x4xf32>
    %12 = vector.extract_strided_slice %3 {offsets = [0, 256], sizes = [4, 256], strides = [1, 1]} : vector<4x2304xf32> to vector<4x256xf32>
    %cst_11 = arith.constant dense<0.000000e+00> : vector<4x256xf32>
    %13 = tpu.matmul %11, %12, %cst_11 {dimension_numbers = #tpu.dot_dimension_numbers<[1], [0], [0], [1], [0, 0, 1, 1], [], []>} : vector<4x4xf32>, vector<4x256xf32>, vector<4x256xf32> -> vector<4x256xf32>
    %14 = arith.addf %9, %13 : vector<4x256xf32>
    %c2 = arith.constant 2 : index
    %c0_12 = arith.constant 0 : index
    %c0_13 = arith.constant 0 : index
    %15 = vector.load %arg3[%c2, %c0_12, %c0_13] : memref<9x4x4xf32, #tpu.memory_space<vmem>>, vector<1x4x4xf32>
    %16 = vector.shape_cast %15 : vector<1x4x4xf32> to vector<4x4xf32>
    %17 = vector.extract_strided_slice %3 {offsets = [0, 512], sizes = [4, 256], strides = [1, 1]} : vector<4x2304xf32> to vector<4x256xf32>
    %cst_14 = arith.constant dense<0.000000e+00> : vector<4x256xf32>
    %18 = tpu.matmul %16, %17, %cst_14 {dimension_numbers = #tpu.dot_dimension_numbers<[1], [0], [0], [1], [0, 0, 1, 1], [], []>} : vector<4x4xf32>, vector<4x256xf32>, vector<4x256xf32> -> vector<4x256xf32>
    %19 = arith.addf %14, %18 : vector<4x256xf32>
    %c3 = arith.constant 3 : index
    %c0_15 = arith.constant 0 : index
    %c0_16 = arith.constant 0 : index
    %20 = vector.load %arg3[%c3, %c0_15, %c0_16] : memref<9x4x4xf32, #tpu.memory_space<vmem>>, vector<1x4x4xf32>
    %21 = vector.shape_cast %20 : vector<1x4x4xf32> to vector<4x4xf32>
    %22 = vector.extract_strided_slice %3 {offsets = [0, 768], sizes = [4, 256], strides = [1, 1]} : vector<4x2304xf32> to vector<4x256xf32>
    %cst_17 = arith.constant dense<0.000000e+00> : vector<4x256xf32>
    %23 = tpu.matmul %21, %22, %cst_17 {dimension_numbers = #tpu.dot_dimension_numbers<[1], [0], [0], [1], [0, 0, 1, 1], [], []>} : vector<4x4xf32>, vector<4x256xf32>, vector<4x256xf32> -> vector<4x256xf32>
    %24 = arith.addf %19, %23 : vector<4x256xf32>
    %c4 = arith.constant 4 : index
    %c0_18 = arith.constant 0 : index
    %c0_19 = arith.constant 0 : index
    %25 = vector.load %arg3[%c4, %c0_18, %c0_19] : memref<9x4x4xf32, #tpu.memory_space<vmem>>, vector<1x4x4xf32>
    %26 = vector.shape_cast %25 : vector<1x4x4xf32> to vector<4x4xf32>
    %27 = vector.extract_strided_slice %3 {offsets = [0, 1024], sizes = [4, 256], strides = [1, 1]} : vector<4x2304xf32> to vector<4x256xf32>
    %cst_20 = arith.constant dense<0.000000e+00> : vector<4x256xf32>
    %28 = tpu.matmul %26, %27, %cst_20 {dimension_numbers = #tpu.dot_dimension_numbers<[1], [0], [0], [1], [0, 0, 1, 1], [], []>} : vector<4x4xf32>, vector<4x256xf32>, vector<4x256xf32> -> vector<4x256xf32>
    %29 = arith.addf %24, %28 : vector<4x256xf32>
    %c5 = arith.constant 5 : index
    %c0_21 = arith.constant 0 : index
    %c0_22 = arith.constant 0 : index
    %30 = vector.load %arg3[%c5, %c0_21, %c0_22] : memref<9x4x4xf32, #tpu.memory_space<vmem>>, vector<1x4x4xf32>
    %31 = vector.shape_cast %30 : vector<1x4x4xf32> to vector<4x4xf32>
    %32 = vector.extract_strided_slice %3 {offsets = [0, 1280], sizes = [4, 256], strides = [1, 1]} : vector<4x2304xf32> to vector<4x256xf32>
    %cst_23 = arith.constant dense<0.000000e+00> : vector<4x256xf32>
    %33 = tpu.matmul %31, %32, %cst_23 {dimension_numbers = #tpu.dot_dimension_numbers<[1], [0], [0], [1], [0, 0, 1, 1], [], []>} : vector<4x4xf32>, vector<4x256xf32>, vector<4x256xf32> -> vector<4x256xf32>
    %34 = arith.addf %29, %33 : vector<4x256xf32>
    %c6 = arith.constant 6 : index
    %c0_24 = arith.constant 0 : index
    %c0_25 = arith.constant 0 : index
    %35 = vector.load %arg3[%c6, %c0_24, %c0_25] : memref<9x4x4xf32, #tpu.memory_space<vmem>>, vector<1x4x4xf32>
    %36 = vector.shape_cast %35 : vector<1x4x4xf32> to vector<4x4xf32>
    %37 = vector.extract_strided_slice %3 {offsets = [0, 1536], sizes = [4, 256], strides = [1, 1]} : vector<4x2304xf32> to vector<4x256xf32>
    %cst_26 = arith.constant dense<0.000000e+00> : vector<4x256xf32>
    %38 = tpu.matmul %36, %37, %cst_26 {dimension_numbers = #tpu.dot_dimension_numbers<[1], [0], [0], [1], [0, 0, 1, 1], [], []>} : vector<4x4xf32>, vector<4x256xf32>, vector<4x256xf32> -> vector<4x256xf32>
    %39 = arith.addf %34, %38 : vector<4x256xf32>
    %c7 = arith.constant 7 : index
    %c0_27 = arith.constant 0 : index
    %c0_28 = arith.constant 0 : index
    %40 = vector.load %arg3[%c7, %c0_27, %c0_28] : memref<9x4x4xf32, #tpu.memory_space<vmem>>, vector<1x4x4xf32>
    %41 = vector.shape_cast %40 : vector<1x4x4xf32> to vector<4x4xf32>
    %42 = vector.extract_strided_slice %3 {offsets = [0, 1792], sizes = [4, 256], strides = [1, 1]} : vector<4x2304xf32> to vector<4x256xf32>
    %cst_29 = arith.constant dense<0.000000e+00> : vector<4x256xf32>
    %43 = tpu.matmul %41, %42, %cst_29 {dimension_numbers = #tpu.dot_dimension_numbers<[1], [0], [0], [1], [0, 0, 1, 1], [], []>} : vector<4x4xf32>, vector<4x256xf32>, vector<4x256xf32> -> vector<4x256xf32>
    %44 = arith.addf %39, %43 : vector<4x256xf32>
    %c8 = arith.constant 8 : index
    %c0_30 = arith.constant 0 : index
    %c0_31 = arith.constant 0 : index
    %45 = vector.load %arg3[%c8, %c0_30, %c0_31] : memref<9x4x4xf32, #tpu.memory_space<vmem>>, vector<1x4x4xf32>
    %46 = vector.shape_cast %45 : vector<1x4x4xf32> to vector<4x4xf32>
    %47 = vector.extract_strided_slice %3 {offsets = [0, 2048], sizes = [4, 256], strides = [1, 1]} : vector<4x2304xf32> to vector<4x256xf32>
    %cst_32 = arith.constant dense<0.000000e+00> : vector<4x256xf32>
    %48 = tpu.matmul %46, %47, %cst_32 {dimension_numbers = #tpu.dot_dimension_numbers<[1], [0], [0], [1], [0, 0, 1, 1], [], []>} : vector<4x4xf32>, vector<4x256xf32>, vector<4x256xf32> -> vector<4x256xf32>
    %49 = arith.addf %44, %48 : vector<4x256xf32>
    %c0_33 = arith.constant 0 : index
    %c0_34 = arith.constant 0 : index
    %50 = vector.load %arg4[%c0_33, %c0_34] : memref<4x1xf32, #tpu.memory_space<vmem>>, vector<4x1xf32>
    %51 = vector.broadcast %50 : vector<4x1xf32> to vector<4x256xf32>
    %52 = arith.addf %49, %51 : vector<4x256xf32>
    %c0_35 = arith.constant 0 : index
    %c0_36 = arith.constant 0 : index
    %53 = vector.load %arg5[%c0_35, %c0_36] : memref<4x1xf32, #tpu.memory_space<vmem>>, vector<4x1xf32>
    %c0_37 = arith.constant 0 : index
    %c0_38 = arith.constant 0 : index
    %c0_39 = arith.constant 0 : index
    %54 = vector.load %arg6[%c0_37, %c0_38, %c0_39] : memref<1x1x256xf32, #tpu.memory_space<vmem>>, vector<1x1x256xf32>
    %55 = vector.shape_cast %54 : vector<1x1x256xf32> to vector<1x256xf32>
    %56 = vector.broadcast %53 : vector<4x1xf32> to vector<4x256xf32>
    %57 = vector.broadcast %55 : vector<1x256xf32> to vector<4x256xf32>
    %58 = arith.mulf %56, %57 : vector<4x256xf32>
    %59 = arith.addf %52, %58 : vector<4x256xf32>
    %cst_40 = arith.constant 2.000000e-01 : f32
    %60 = vector.broadcast %cst_40 : f32 to vector<4x256xf32>
    %61 = arith.mulf %60, %59 : vector<4x256xf32>
    %62 = arith.maximumf %59, %61 : vector<4x256xf32>
    %cst_41 = arith.constant dense<0.000000e+00> : vector<4xf32>
    %63 = vector.multi_reduction <add>, %62, %cst_41 [1] : vector<4x256xf32> to vector<4xf32>
    %64 = vector.shape_cast %63 : vector<4xf32> to vector<4x1xf32>
    %cst_42 = arith.constant 2.560000e+02 : f32
    %65 = vector.broadcast %cst_42 : f32 to vector<4x1xf32>
    %66 = arith.divf %64, %65 : vector<4x1xf32>
    %67 = vector.broadcast %66 : vector<4x1xf32> to vector<4x256xf32>
    %68 = arith.subf %62, %67 : vector<4x256xf32>
    %69 = arith.mulf %68, %68 : vector<4x256xf32>
    %cst_43 = arith.constant dense<0.000000e+00> : vector<4xf32>
    %70 = vector.multi_reduction <add>, %69, %cst_43 [1] : vector<4x256xf32> to vector<4xf32>
    %71 = vector.shape_cast %70 : vector<4xf32> to vector<4x1xf32>
    %cst_44 = arith.constant 2.560000e+02 : f32
    %72 = vector.broadcast %cst_44 : f32 to vector<4x1xf32>
    %73 = arith.divf %71, %72 : vector<4x1xf32>
    %74 = vector.broadcast %66 : vector<4x1xf32> to vector<4x256xf32>
    %75 = arith.subf %62, %74 : vector<4x256xf32>
    %cst_45 = arith.constant 9.99999974E-6 : f32
    %76 = vector.broadcast %cst_45 : f32 to vector<4x1xf32>
    %77 = arith.addf %73, %76 : vector<4x1xf32>
    %78 = math.rsqrt %77 : vector<4x1xf32>
    %79 = vector.broadcast %78 : vector<4x1xf32> to vector<4x256xf32>
    %80 = arith.mulf %75, %79 : vector<4x256xf32>
    %c0_46 = arith.constant 0 : index
    %c0_47 = arith.constant 0 : index
    %c0_48 = arith.constant 0 : index
    %81 = vector.load %arg7[%c0_46, %c0_47, %c0_48] : memref<1x1x8xf32, #tpu.memory_space<vmem>>, vector<1x1x8xf32>
    %82 = vector.shape_cast %81 : vector<1x1x8xf32> to vector<1x8xf32>
    %c0_49 = arith.constant 0 : index
    %c0_50 = arith.constant 0 : index
    %83 = vector.load %arg8[%c0_49, %c0_50] : memref<4x8xf32, #tpu.memory_space<vmem>>, vector<4x8xf32>
    %84 = vector.broadcast %82 : vector<1x8xf32> to vector<4x8xf32>
    %85 = arith.mulf %83, %84 : vector<4x8xf32>
    %cst_51 = arith.constant dense<0.000000e+00> : vector<4xf32>
    %86 = vector.multi_reduction <add>, %85, %cst_51 [1] : vector<4x8xf32> to vector<4xf32>
    %87 = vector.shape_cast %86 : vector<4xf32> to vector<4x1xf32>
    %c0_52 = arith.constant 0 : index
    %c0_53 = arith.constant 0 : index
    %88 = vector.load %arg9[%c0_52, %c0_53] : memref<4x1xf32, #tpu.memory_space<vmem>>, vector<4x1xf32>
    %89 = arith.addf %87, %88 : vector<4x1xf32>
    %c0_54 = arith.constant 0 : index
    %c0_55 = arith.constant 0 : index
    %90 = vector.load %arg10[%c0_54, %c0_55] : memref<4x8xf32, #tpu.memory_space<vmem>>, vector<4x8xf32>
    %91 = vector.broadcast %82 : vector<1x8xf32> to vector<4x8xf32>
    %92 = arith.mulf %90, %91 : vector<4x8xf32>
    %cst_56 = arith.constant dense<0.000000e+00> : vector<4xf32>
    %93 = vector.multi_reduction <add>, %92, %cst_56 [1] : vector<4x8xf32> to vector<4xf32>
    %94 = vector.shape_cast %93 : vector<4xf32> to vector<4x1xf32>
    %c0_57 = arith.constant 0 : index
    %c0_58 = arith.constant 0 : index
    %95 = vector.load %arg11[%c0_57, %c0_58] : memref<4x1xf32, #tpu.memory_space<vmem>>, vector<4x1xf32>
    %96 = arith.addf %94, %95 : vector<4x1xf32>
    %97 = vector.broadcast %89 : vector<4x1xf32> to vector<4x256xf32>
    %98 = arith.mulf %97, %80 : vector<4x256xf32>
    %99 = vector.broadcast %96 : vector<4x1xf32> to vector<4x256xf32>
    %100 = arith.addf %98, %99 : vector<4x256xf32>
    %c0_59 = arith.constant 0 : index
    %c0_60 = arith.constant 0 : index
    %c0_61 = arith.constant 0 : index
    %101 = vector.load %arg12[%c0_59, %c0_60, %c0_61] : memref<1x4x256xf32, #tpu.memory_space<vmem>>, vector<1x4x256xf32>
    %102 = vector.shape_cast %101 : vector<1x4x256xf32> to vector<4x256xf32>
    %103 = vector.shape_cast %100 : vector<4x256xf32> to vector<1x4x256xf32>
    tpu.vector_store %arg12[%c0_59, %c0_60, %c0_61], %103 {strides = array<i32>} : memref<1x4x256xf32, #tpu.memory_space<vmem>>, vector<1x4x256xf32>,
    return
  }
  func.func @transform_0(%arg0: i32) -> (i32, i32, i32) {
    %c0_i32 = arith.constant 0 : i32
    %c0_i32_0 = arith.constant 0 : i32
    %c0_i32_1 = arith.constant 0 : i32
    return %arg0, %c0_i32, %c0_i32_0 : i32, i32, i32
  }
  func.func @transform_1(%arg0: i32) -> (i32, i32) {
    %c0_i32 = arith.constant 0 : i32
    %c0_i32_0 = arith.constant 0 : i32
    %c0_i32_1 = arith.constant 0 : i32
    return %c0_i32, %c0_i32_0 : i32, i32
  }
  func.func @transform_2(%arg0: i32) -> (i32, i32, i32) {
    %c0_i32 = arith.constant 0 : i32
    %c0_i32_0 = arith.constant 0 : i32
    %c0_i32_1 = arith.constant 0 : i32
    %c0_i32_2 = arith.constant 0 : i32
    return %c0_i32, %c0_i32_0, %c0_i32_1 : i32, i32, i32
  }
  func.func @transform_3(%arg0: i32) -> (i32, i32) {
    %c0_i32 = arith.constant 0 : i32
    %c0_i32_0 = arith.constant 0 : i32
    %c0_i32_1 = arith.constant 0 : i32
    return %c0_i32, %c0_i32_0 : i32, i32
  }
  func.func @transform_4(%arg0: i32) -> (i32, i32) {
    %c0_i32 = arith.constant 0 : i32
    %c0_i32_0 = arith.constant 0 : i32
    %c0_i32_1 = arith.constant 0 : i32
    return %c0_i32, %c0_i32_0 : i32, i32
  }
  func.func @transform_5(%arg0: i32) -> (i32, i32, i32) {
    %c0_i32 = arith.constant 0 : i32
    %c0_i32_0 = arith.constant 0 : i32
    %c0_i32_1 = arith.constant 0 : i32
    return %arg0, %c0_i32, %c0_i32_0 : i32, i32, i32
  }
  func.func @transform_6(%arg0: i32) -> (i32, i32, i32) {
    %c0_i32 = arith.constant 0 : i32
    %c0_i32_0 = arith.constant 0 : i32
    %c0_i32_1 = arith.constant 0 : i32
    return %arg0, %c0_i32, %c0_i32_0 : i32, i32, i32
  }
  func.func @transform_7(%arg0: i32) -> (i32, i32) {
    %c0_i32 = arith.constant 0 : i32
    %c0_i32_0 = arith.constant 0 : i32
    %c0_i32_1 = arith.constant 0 : i32
    return %c0_i32, %c0_i32_0 : i32, i32
  }
  func.func @transform_8(%arg0: i32) -> (i32, i32) {
    %c0_i32 = arith.constant 0 : i32
    %c0_i32_0 = arith.constant 0 : i32
    %c0_i32_1 = arith.constant 0 : i32
    return %c0_i32, %c0_i32_0 : i32, i32
  }
  func.func @transform_9(%arg0: i32) -> (i32, i32) {
    %c0_i32 = arith.constant 0 : i32
    %c0_i32_0 = arith.constant 0 : i32
    %c0_i32_1 = arith.constant 0 : i32
    return %c0_i32, %c0_i32_0 : i32, i32
  }
  func.func @transform_10(%arg0: i32) -> (i32, i32) {
    %c0_i32 = arith.constant 0 : i32
    %c0_i32_0 = arith.constant 0 : i32
    %c0_i32_1 = arith.constant 0 : i32
    return %c0_i32, %c0_i32_0 : i32, i32
  }
  func.func @transform_11(%arg0: i32) -> (i32, i32, i32) {
    %c0_i32 = arith.constant 0 : i32
    %c0_i32_0 = arith.constant 0 : i32
    %c0_i32_1 = arith.constant 0 : i32
    return %arg0, %c0_i32, %c0_i32_0 : i32, i32, i32
  }
}

</mosaic_0001>

<bundles_post_ra>
// kernel: tpu_custom_call.1
= control target key start
LH: loop header
LB: loop body
LE: loop exit
PB: predicated region body
PF: predicated region fallthrough
CT: control target
= control target key end

     0   :  { %s2683_s0 = inlined_call_operand.vmem [shape: f32[2,4,64], index: 0, kind: input, shape index: {}]   ;;  %s2684_s1 = inlined_call_operand.hbm [shape: f32[64,2304], index: 1, kind: input, shape index: {}]   ;;  %s2685_s2 = inlined_call_operand.vmem [shape: f32[9,4,4], index: 2, kind: input, shape index: {}]   ;;  %s2686_s3 = inlined_call_operand.vmem [shape: f32[4,1], index: 3, kind: input, shape index: {}]   ;;  %s2687_s4 = inlined_call_operand.vmem [shape: f32[4,1], index: 4, kind: input, shape index: {}]   ;;  %s2688_s5 = inlined_call_operand.vmem [shape: f32[2,1,256], index: 5, kind: input, shape index: {}]   ;;  %s2689_s6 = inlined_call_operand.vmem [shape: f32[2,1,8], index: 6, kind: input, shape index: {}]   ;;  %s2690_s7 = inlined_call_operand.vmem [shape: f32[4,8], index: 7, kind: input, shape index: {}]   ;;  %s2691_s8 = inlined_call_operand.vmem [shape: f32[4,1], index: 8, kind: input, shape index: {}]   ;;  %s2692_s9 = inlined_call_operand.vmem [shape: f32[4,8], index: 9, kind: input, shape index: {}]   ;;  %s2693_s10 = inlined_call_operand.vmem [shape: f32[4,1], index: 10, kind: input, shape index: {}]   ;;  %s2694_s11 = inlined_call_operand.hbm [shape: f32[2,4,256], index: 11, kind: output, shape index: {}]  }
   0x1   :  { %2695 = sst [smem:[#allocation8_spill]] %s2683_s0 }
   0x2   :  { %2696 = sst [smem:[#allocation9_spill]] %s2684_s1 }
   0x3   :  { %16 = vsyncpa [#allocation3], 0 }
   0x4   :  { %17 = vsyncpa [#allocation4], 0 }
   0x5   :  { %19 = vsyncpa [#allocation4 + $0x1], 0  ;;  %s2448_s17 = smov 0   ;;  %s2450_s18 = smov 0  }
   0x6   :  { %s2452_s19 = smov 0   ;;  %s2454_s20 = smov 0  }
   0x7 LB: > { %s2469_s21 = sadd.s32 4294967295, %s2380_s20   ;;  %s2172_s22 = sadd.s32 4294967294, %s2380_s20   ;;  %s2380_s20 = sphi %s2454_s20, %s2706_s20   ;;  %s2376_s19 = sphi %s2452_s19, %s2705_s19   ;;  %s2372_s18 = sphi %s2450_s18, %s2704_s18   ;;  %s2368_s17 = sphi %s2448_s17, %s2703_s17  }
   0x8   : > { %s2473_s23 = sadd.s32 1, %s2380_s20   ;;  %s278_s24 = sadd.s32 1, %s2376_s19 }
   0x9   : > { %s275_s25 = ssub.s32 %s2380_s20, %s2473_s23  ;;  %p288_p0 = scmp.ne.s32.totalorder %s2376_s19, %s2372_s18 }
   0xa   : > { %p276_p1 = scmp.eq.s32.totalorder %s275_s25, 0  ;;  %p289_p2 = scmp.eq.s32.totalorder %s2469_s21, 1 }
   0xb   : > { %p294_p3 = scmp.ne.s32.totalorder %s2372_s18, %s2368_s17  ;;  %p295_p4 = scmp.eq.s32.totalorder %s2172_s22, 1 }
   0xc   : > { %s2484_s26 = scalar_select %p276_p1, %s2376_s19, %s278_s24  }
   0xd   : > { %p2486_p5 = por %p289_p2, %p288_p0  ;;  %p2490_p6 = por %p295_p4, %p294_p3 }
   0xe   : > { %p2173_p7 = scmp.ge.s32.totalorder %s2380_s20, 1  ;;  %p302_p8 = scmp.lt.s32.totalorder %s2380_s20, 3 }
   0xf   : > { %s2698_s28 = scalar_select %p2490_p6, 1, 0 }
  0x10   : > { %p2246_p9 = scmp.eq.s32.totalorder %s2469_s21, 0  ;;  %p2497_p10 = pnand %p2173_p7, %p302_p8 }
  0x11   : > { %s2382_s30 = smov [#allocation2]  }
  0x12   : > { %s314_s12 = sshll.u32 %s2382_s30, 4  ;;  %p2238_p11 = pneg %p2497_p10  ;;  %s315_s12 = int_to_ptr.vmem [resolvable:$true] %s314_s12 }
  0x13   : > { %s2301_s13 = scalar_lea.vmem %s315_s12, 18432  ;;  %p2309_p3 = scmp.lt.s32.totalorder %s315_s12, %s315_s12 }
  0x14   : > { %p2239_p12 = pnand %p2246_p9, %p2238_p11  ;;  %p2302_p0 = scmp.ne.s32.totalorder %s315_s12, %s2301_s13 }
  0x15   : > { %p2310_p4 = scmp.lt.s32.totalorder %s2301_s13, %s2301_s13 }
  0x16   : > { %p2292_p13 = pneg %p2239_p12 }
  0x17   : > { %p2311_p6 = por %p2310_p4, %p2309_p3 }
  0x18   : > { %p2304_p1 = pnand %p2302_p0, %p2292_p13 }
  0x1a   : > { %p2305_p2 = pneg %p2304_p1 }
  0x1c   : > { %p2312_p7 = pnand %p2311_p6, %p2305_p2 }
  0x1e   : > { %2315 = shalt.err (!%p2312_p7)
}
  0x1f   : > { %s2383_s14 = smov 2304   ;;  %s2384_s15 = smov 144  }
  0x20   : > { %s2700_s1 = sld [smem:[#allocation9_spill]] }
  0x22   : > { %371 = sbr.rel (%p2497_p10) target bundleno = 887 (0x377), region = 64 }
  0x26   : > { %2241 = dma.hbm_to_vmem [thread:$0]  (!%p2239_p12), %s2700_s1, 18432, %s315_s12, [#allocation3], %s2383_s14, %s2383_s14, %s2384_s15  }
  0x27   : > { %2359 = dma.done.wait (%p2246_p9), [#allocation3], 18432  }
  0x28   : > { %2361 = vsyncadd (%p2246_p9), [#allocation3], 4294948864  ;;  %v2385_v0 = vmov 0.0   ;;  %v556_v1 = vld [vmem:[#allocation2 + $0x3f8] sm:$0xff]  ;;  %v558_v2 = vld [vmem:[#allocation2 + $0x408] sm:$0xff]  ;;  %p417_p6 = scmp.lt.s32.totalorder %s2469_s21, 1 }
  0x29   : > { %641 = vmatprep.mubr.f32.mxu0 %v2385_v0  ;;  %712 = vmatprep.mubr.f32.mxu1 %v2385_v0  ;;  %v555_v3 = vld [vmem:[#allocation2 + $0x3f0] sm:$0xff]  ;;  %v557_v4 = vld [vmem:[#allocation2 + $0x400] sm:$0xff]  ;;  %v538_v5 = vld [vmem:[#allocation2 + $0x368] sm:$0xff]  ;;  %s2701_s0 = sld [smem:[#allocation8_spill]]  ;;  %vm573_vm0 = vcmask 523264   ;;  %vm1223_vm1 = vcmask 1043456  }
  0x2a   : > { %593 = vmatprep.subr.mxu0 %v556_v1  ;;  %664 = vmatprep.subr.mxu1 %v558_v2  ;;  %v540_v6 = vld [vmem:[#allocation2 + $0x378] sm:$0xff]  ;;  %v537_v7 = vld [vmem:[#allocation2 + $0x360] sm:$0xff]  ;;  %v539_v8 = vld [vmem:[#allocation2 + $0x370] sm:$0xff]  ;;  %s2520_s24 = scalar_select %p417_p6, %s2469_s21, 1  ;;  %vm1219_vm2 = vcmask 31744   ;;  %vm2033_vm3 = vcmask 60416  }
  0x2b   : > { %594 = vmatpush1.msra.mxu0 %v555_v3  ;;  %665 = vmatpush1.msra.mxu1 %v557_v4  ;;  %v520_v9 = vld [vmem:[#allocation2 + $0x2d8] sm:$0xff]  ;;  %v522_v10 = vld [vmem:[#allocation2 + $0x2e8] sm:$0xff]  ;;  %v519_v11 = vld [vmem:[#allocation2 + $0x2d0] sm:$0xff]  ;;  %s414_s13 = sand.u32 1, %s2372_s18  }
  0x2c   : > { %595 = vmatprep.subr.mxu0 %v538_v5  ;;  %666 = vmatprep.subr.mxu1 %v540_v6  ;;  %v521_v12 = vld [vmem:[#allocation2 + $0x2e0] sm:$0xff]  ;;  %v502_v13 = vld [vmem:[#allocation2 + $0x248] sm:$0xff]  ;;  %v504_v14 = vld [vmem:[#allocation2 + $0x258] sm:$0xff]  ;;  %s2179_s25 = sshll.u32 %s2520_s24, 2  ;;  %s427_s29 = scalar_lea.vmem %s2689_s6, %s2520_s24 }
  0x2d   : > { %596 = vmatpush1.msra.mxu0 %v537_v7  ;;  %667 = vmatpush1.msra.mxu1 %v539_v8  ;;  %v501_v15 = vld [vmem:[#allocation2 + $0x240] sm:$0xff]  ;;  %v503_v16 = vld [vmem:[#allocation2 + $0x250] sm:$0xff]  ;;  %v484_v17 = vld [vmem:[#allocation2 + $0x1b8] sm:$0xff]  ;;  %s2180_s15 = sshll.u32 %s2520_s24, 1  ;;  %s2178_s14 = sshll.u32 %s414_s13, 3 }
  0x2e   : > { %597 = vmatprep.subr.mxu0 %v520_v9  ;;  %668 = vmatprep.subr.mxu1 %v522_v10  ;;  %v486_v18 = vld [vmem:[#allocation2 + $0x1c8] sm:$0xff]  ;;  %v483_v19 = vld [vmem:[#allocation2 + $0x1b0] sm:$0xff]  ;;  %v485_v20 = vld [vmem:[#allocation2 + $0x1c0] sm:$0xff]  ;;  %s416_s16 = scalar_lea.vmem [#allocation5], %s2178_s14  ;;  %s2066_s30 = scalar_lea.sflag [#allocation4], %s414_s13 }
  0x2f   : > { %598 = vmatpush1.msra.mxu0 %v519_v11  ;;  %669 = vmatpush1.msra.mxu1 %v521_v12  ;;  %v466_v21 = vld [vmem:[#allocation2 + $0x128] sm:$0xff]  ;;  %v468_v22 = vld [vmem:[#allocation2 + $0x138] sm:$0xff]  ;;  %v465_v23 = vld [vmem:[#allocation2 + $0x120] sm:$0xff]  ;;  %s420_s12 = scalar_lea.vmem %s2701_s0, %s2179_s25  ;;  %s424_s25 = scalar_lea.vmem %s2688_s5, %s2180_s15 }
  0x30   : > { %599 = vmatprep.subr.mxu0 %v502_v13  ;;  %670 = vmatprep.subr.mxu1 %v504_v14  ;;  %v467_v24 = vld [vmem:[#allocation2 + $0x130] sm:$0xff]  ;;  %v448_v25 = vld [vmem:[#allocation2 + $0x98] sm:$0xff]  ;;  %v450_v26 = vld [vmem:[#allocation2 + $0xa8] sm:$0xff]  ;;  %s2231_s15 = sshll.u32 %s2469_s21, 7  ;;  %s2080_s22 = sshll.u32 %s416_s16, 4  ;;  %s2081_s22 = int_to_ptr.vmem [resolvable:$true] %s2080_s22 }
  0x31   : > { %600 = vmatpush1.msra.mxu0 %v501_v15  ;;  %671 = vmatpush1.msra.mxu1 %v503_v16  ;;  %v447_v27 = vld [vmem:[#allocation2 + $0x90] sm:$0xff]  ;;  %v449_v28 = vld [vmem:[#allocation2 + $0xa0] sm:$0xff]  ;;  %v430_v29 = vld [vmem:[#allocation2 + $0x8] sm:$0xff]  ;;  %s2387_s0 = smov [#allocation5]  }
  0x32   : > { %601 = vmatprep.subr.mxu0 %v484_v17  ;;  %672 = vmatprep.subr.mxu1 %v486_v18  ;;  %v432_v30 = vld [vmem:[#allocation2 + $0x18] sm:$0xff]  ;;  %v429_v31 = vld [vmem:[#allocation2] sm:$0xff]  ;;  %v431_v32 = vld [vmem:[#allocation2 + $0x10] sm:$0xff]  ;;  %s2320_s1 = sshll.u32 %s2387_s0, 4  ;;  %s2321_s1 = int_to_ptr.vmem [resolvable:$false] %s2320_s1 }
  0x33   : > { %602 = vmatpush1.msra.mxu0 %v483_v19  ;;  %673 = vmatpush1.msra.mxu1 %v485_v20  ;;  %v2526_v33 = vld [vmem:[%s420_s12] sm:$0xf]  ;;  %v560_v34 = vld [vmem:[#allocation2 + $0x418] sm:$0xff]  ;;  %v562_v35 = vld [vmem:[#allocation2 + $0x428] sm:$0xff]  ;;  %s2316_s12 = scalar_lea.vmem %s2081_s22, 128  ;;  %s2322_s21 = scalar_lea.vmem %s2321_s1, 256 }
  0x34   : > { %603 = vmatprep.subr.mxu0 %v466_v21  ;;  %674 = vmatprep.subr.mxu1 %v468_v22  ;;  %v559_v36 = vld [vmem:[#allocation2 + $0x410] sm:$0xff]  ;;  %v561_v37 = vld [vmem:[#allocation2 + $0x420] sm:$0xff]  ;;  %v542_v38 = vld [vmem:[#allocation2 + $0x388] sm:$0xff]  ;;  %p2317_p8 = scmp.ne.s32.totalorder %s2081_s22, %s2316_s12  ;;  %p2323_p11 = scmp.lt.s32.totalorder %s2081_s22, %s2321_s1 }
  0x35   : > { %604 = vmatpush1.msra.mxu0 %v465_v23  ;;  %675 = vmatpush1.msra.mxu1 %v467_v24  ;;  %v544_v39 = vld [vmem:[#allocation2 + $0x398] sm:$0xff]  ;;  %v541_v40 = vld [vmem:[#allocation2 + $0x380] sm:$0xff]  ;;  %v543_v41 = vld [vmem:[#allocation2 + $0x390] sm:$0xff]  ;;  %p2324_p12 = scmp.lt.s32.totalorder %s2322_s21, %s2316_s12 }
  0x36   : > { %605 = vmatprep.subr.mxu0 %v448_v25  ;;  %676 = vmatprep.subr.mxu1 %v450_v26  ;;  %v524_v42 = vld [vmem:[#allocation2 + $0x2f8] sm:$0xff]  ;;  %v526_v43 = vld [vmem:[#allocation2 + $0x308] sm:$0xff]  ;;  %v523_v44 = vld [vmem:[#allocation2 + $0x2f0] sm:$0xff]  ;;  %p2318_p9 = pnand %p2317_p8, %p2486_p5 }
  0x37   : > { %606 = vmatpush1.msra.mxu0 %v447_v27  ;;  %677 = vmatpush1.msra.mxu1 %v449_v28  ;;  %v525_v45 = vld [vmem:[#allocation2 + $0x300] sm:$0xff]  ;;  %v506_v46 = vld [vmem:[#allocation2 + $0x268] sm:$0xff]  ;;  %v508_v47 = vld [vmem:[#allocation2 + $0x278] sm:$0xff]  ;;  %p2325_p13 = por %p2324_p12, %p2323_p11 }
  0x38   : > { %607 = vmatprep.subr.mxu0 %v430_v29  ;;  %678 = vmatprep.subr.mxu1 %v432_v30  ;;  %v505_v48 = vld [vmem:[#allocation2 + $0x260] sm:$0xff]  ;;  %v507_v49 = vld [vmem:[#allocation2 + $0x270] sm:$0xff]  ;;  %v488_v50 = vld [vmem:[#allocation2 + $0x1d8] sm:$0xff]  ;;  %p2319_p10 = pneg %p2318_p9 }
  0x39   : > { %608 = vmatpush1.msra.mxu0 %v429_v31  ;;  %679 = vmatpush1.msra.mxu1 %v431_v32  ;;  %v487_v51 = vld [vmem:[#allocation2 + $0x1d0] sm:$0xff]  ;;  %v490_v52 = vld [vmem:[#allocation2 + $0x1e8] sm:$0xff]  ;;  %v489_v54 = vld [vmem:[#allocation2 + $0x1e0] sm:$0xff] }
  0x3a   : > { %2181 = vmatmul.mubr.msk.f32.vlgmr.msra.gmra.mxu0 %vm573_vm0, %v2526_v33  ;;  %2182 = vmatmul.mubr.msk.f32.vlgmr.msra.gmra.mxu1 %vm573_vm0, %v2526_v33  ;;  %v470_v53 = vld [vmem:[#allocation2 + $0x148] sm:$0xff]  ;;  %v469_v55 = vld [vmem:[#allocation2 + $0x140] sm:$0xff]  ;;  %v472_v56 = vld [vmem:[#allocation2 + $0x158] sm:$0xff]  ;;  %p2326_p0 = pnand %p2325_p13, %p2319_p10 }
  0x3b   : > { %735 = vmatprep.subr.mxu0 %v560_v34  ;;  %806 = vmatprep.subr.mxu1 %v562_v35  ;;  %v452_v57 = vld [vmem:[#allocation2 + $0xb8] sm:$0xff]  ;;  %v471_v58 = vld [vmem:[#allocation2 + $0x150] sm:$0xff]  ;;  %v454_v60 = vld [vmem:[#allocation2 + $0xc8] sm:$0xff] }
  0x3c   : > { %736 = vmatpush1.msra.mxu0 %v559_v36  ;;  %807 = vmatpush1.msra.mxu1 %v561_v37  ;;  %v451_v59 = vld [vmem:[#allocation2 + $0xb0] sm:$0xff]  ;;  %v434_v61 = vld [vmem:[#allocation2 + $0x28] sm:$0xff]  ;;  %v453_v62 = vld [vmem:[#allocation2 + $0xc0] sm:$0xff] }
  0x3d   : > { %737 = vmatprep.subr.mxu0 %v542_v38  ;;  %808 = vmatprep.subr.mxu1 %v544_v39  ;;  %v433_v63 = vld [vmem:[#allocation2 + $0x20] sm:$0xff]  ;;  %v436_v1 = vld [vmem:[#allocation2 + $0x38] sm:$0xff]  ;;  %v563_v3 = vld [vmem:[#allocation2 + $0x430] sm:$0xff] }
  0x3e   : > { %738 = vmatpush1.msra.mxu0 %v541_v40  ;;  %809 = vmatpush1.msra.mxu1 %v543_v41  ;;  %v564_v2 = vld [vmem:[#allocation2 + $0x438] sm:$0xff]  ;;  %v435_v4 = vld [vmem:[#allocation2 + $0x30] sm:$0xff]  ;;  %v546_v5 = vld [vmem:[#allocation2 + $0x3a8] sm:$0xff] }
  0x3f   : > { %739 = vmatprep.subr.mxu0 %v524_v42  ;;  %810 = vmatprep.subr.mxu1 %v526_v43  ;;  %v545_v6 = vld [vmem:[#allocation2 + $0x3a0] sm:$0xff]  ;;  %v566_v7 = vld [vmem:[#allocation2 + $0x448] sm:$0xff]  ;;  %v528_v8 = vld [vmem:[#allocation2 + $0x318] sm:$0xff] }
  0x40   : > { %740 = vmatpush1.msra.mxu0 %v523_v44  ;;  %811 = vmatpush1.msra.mxu1 %v525_v45  ;;  %v527_v9 = vld [vmem:[#allocation2 + $0x310] sm:$0xff]  ;;  %v565_v10 = vld [vmem:[#allocation2 + $0x440] sm:$0xff]  ;;  %v510_v11 = vld [vmem:[#allocation2 + $0x288] sm:$0xff] }
  0x41   : > { %741 = vmatprep.subr.mxu0 %v506_v46  ;;  %812 = vmatprep.subr.mxu1 %v508_v47  ;;  %v548_v12 = vld [vmem:[#allocation2 + $0x3b8] sm:$0xff]  ;;  %v509_v13 = vld [vmem:[#allocation2 + $0x280] sm:$0xff]  ;;  %v547_v14 = vld [vmem:[#allocation2 + $0x3b0] sm:$0xff] }
  0x42   : > { %742 = vmatpush1.msra.mxu0 %v505_v48  ;;  %813 = vmatpush1.msra.mxu1 %v507_v49  ;;  %v492_v15 = vld [vmem:[#allocation2 + $0x1f8] sm:$0xff]  ;;  %v530_v16 = vld [vmem:[#allocation2 + $0x328] sm:$0xff]  ;;  %v491_v17 = vld [vmem:[#allocation2 + $0x1f0] sm:$0xff] }
  0x43   : > { %743 = vmatprep.subr.mxu0 %v488_v50  ;;  %783 = vmatprep.mubr.f32.mxu0 %v2385_v0  ;;  %v529_v18 = vld [vmem:[#allocation2 + $0x320] sm:$0xff]  ;;  %v474_v19 = vld [vmem:[#allocation2 + $0x168] sm:$0xff]  ;;  %v512_v20 = vld [vmem:[#allocation2 + $0x298] sm:$0xff] }
  0x44   : > { %744 = vmatpush1.msra.mxu0 %v487_v51  ;;  %814 = vmatprep.subr.mxu1 %v490_v52  ;;  %v473_v21 = vld [vmem:[#allocation2 + $0x160] sm:$0xff]  ;;  %v511_v22 = vld [vmem:[#allocation2 + $0x290] sm:$0xff]  ;;  %v456_v23 = vld [vmem:[#allocation2 + $0xd8] sm:$0xff] }
  0x45   : > { %745 = vmatprep.subr.mxu0 %v470_v53  ;;  %815 = vmatpush1.msra.mxu1 %v489_v54  ;;  %v455_v24 = vld [vmem:[#allocation2 + $0xd0] sm:$0xff]  ;;  %v494_v25 = vld [vmem:[#allocation2 + $0x208] sm:$0xff]  ;;  %v493_v27 = vld [vmem:[#allocation2 + $0x200] sm:$0xff] }
  0x46   : > { %746 = vmatpush1.msra.mxu0 %v469_v55  ;;  %816 = vmatprep.subr.mxu1 %v472_v56  ;;  %v438_v26 = vld [vmem:[#allocation2 + $0x48] sm:$0xff]  ;;  %v437_v28 = vld [vmem:[#allocation2 + $0x40] sm:$0xff]  ;;  %v476_v29 = vld [vmem:[#allocation2 + $0x178] sm:$0xff] }
  0x47   : > { %747 = vmatprep.subr.mxu0 %v452_v57  ;;  %817 = vmatpush1.msra.mxu1 %v471_v58  ;;  %v568_v30 = vld [vmem:[#allocation2 + $0x458] sm:$0xff]  ;;  %v567_v31 = vld [vmem:[#allocation2 + $0x450] sm:$0xff]  ;;  %v550_v34 = vld [vmem:[#allocation2 + $0x3c8] sm:$0xff] }
  0x48   : > { %748 = vmatpush1.msra.mxu0 %v451_v59  ;;  %818 = vmatprep.subr.mxu1 %v454_v60  ;;  %v475_v32 = vld [vmem:[#allocation2 + $0x170] sm:$0xff]  ;;  %v458_v35 = vld [vmem:[#allocation2 + $0xe8] sm:$0xff]  ;;  %v549_v36 = vld [vmem:[#allocation2 + $0x3c0] sm:$0xff] }
  0x49   : > { %749 = vmatprep.subr.mxu0 %v434_v61  ;;  %819 = vmatpush1.msra.mxu1 %v453_v62  ;;  %v457_v37 = vld [vmem:[#allocation2 + $0xe0] sm:$0xff]  ;;  %v532_v38 = vld [vmem:[#allocation2 + $0x338] sm:$0xff]  ;;  %v531_v40 = vld [vmem:[#allocation2 + $0x330] sm:$0xff] }
  0x4a   : > { %750 = vmatpush1.msra.mxu0 %v433_v63  ;;  %820 = vmatprep.subr.mxu1 %v436_v1  ;;  %v440_v39 = vld [vmem:[#allocation2 + $0x58] sm:$0xff]  ;;  %v439_v41 = vld [vmem:[#allocation2 + $0x50] sm:$0xff]  ;;  %v514_v42 = vld [vmem:[#allocation2 + $0x2a8] sm:$0xff] }
  0x4b   : > { %2183 = vmatmul.mubr.msk.f32.vlgmr.msra.gmra.mxu0 %vm573_vm0, %v2526_v33  ;;  %877 = vmatprep.subr.mxu0 %v564_v2  ;;  %v513_v43 = vld [vmem:[#allocation2 + $0x2a0] sm:$0xff]  ;;  %v570_v44 = vld [vmem:[#allocation2 + $0x468] sm:$0xff]  ;;  %v496_v45 = vld [vmem:[#allocation2 + $0x218] sm:$0xff] }
  0x4c   : > { %878 = vmatpush1.msra.mxu0 %v563_v3  ;;  %821 = vmatpush1.msra.mxu1 %v435_v4  ;;  %v569_v46 = vld [vmem:[#allocation2 + $0x460] sm:$0xff]  ;;  %v495_v47 = vld [vmem:[#allocation2 + $0x210] sm:$0xff]  ;;  %v552_v48 = vld [vmem:[#allocation2 + $0x3d8] sm:$0xff] }
  0x4d   : > { %879 = vmatprep.subr.mxu0 %v546_v5  ;;  %854 = vmatprep.mubr.f32.mxu1 %v2385_v0  ;;  %v478_v49 = vld [vmem:[#allocation2 + $0x188] sm:$0xff]  ;;  %v551_v50 = vld [vmem:[#allocation2 + $0x3d0] sm:$0xff]  ;;  %v477_v51 = vld [vmem:[#allocation2 + $0x180] sm:$0xff] }
  0x4e   : > { %880 = vmatpush1.msra.mxu0 %v545_v6  ;;  %948 = vmatprep.subr.mxu1 %v566_v7  ;;  %v534_v52 = vld [vmem:[#allocation2 + $0x348] sm:$0xff]  ;;  %v460_v53 = vld [vmem:[#allocation2 + $0xf8] sm:$0xff]  ;;  %v533_v54 = vld [vmem:[#allocation2 + $0x340] sm:$0xff] }
  0x4f   : > { %881 = vmatprep.subr.mxu0 %v528_v8  ;;  %2184 = vmatmul.mubr.msk.f32.vlgmr.msra.gmra.mxu1 %vm573_vm0, %v2526_v33  ;;  %v459_v55 = vld [vmem:[#allocation2 + $0xf0] sm:$0xff]  ;;  %v516_v56 = vld [vmem:[#allocation2 + $0x2b8] sm:$0xff]  ;;  %v442_v57 = vld [vmem:[#allocation2 + $0x68] sm:$0xff] }
  0x50   : > { %882 = vmatpush1.msra.mxu0 %v527_v9  ;;  %949 = vmatpush1.msra.mxu1 %v565_v10  ;;  %v515_v58 = vld [vmem:[#allocation2 + $0x2b0] sm:$0xff]  ;;  %v441_v59 = vld [vmem:[#allocation2 + $0x60] sm:$0xff]  ;;  %v498_v60 = vld [vmem:[#allocation2 + $0x228] sm:$0xff] }
  0x51   : > { %883 = vmatprep.subr.mxu0 %v510_v11  ;;  %950 = vmatprep.subr.mxu1 %v548_v12  ;;  %v497_v61 = vld [vmem:[#allocation2 + $0x220] sm:$0xff]  ;;  %v572_v62 = vld [vmem:[#allocation2 + $0x478] sm:$0xff]  ;;  %v571_v1 = vld [vmem:[#allocation2 + $0x470] sm:$0xff] }
  0x52   : > { %884 = vmatpush1.msra.mxu0 %v509_v13  ;;  %951 = vmatpush1.msra.mxu1 %v547_v14  ;;  %v480_v63 = vld [vmem:[#allocation2 + $0x198] sm:$0xff]  ;;  %v479_v2 = vld [vmem:[#allocation2 + $0x190] sm:$0xff]  ;;  %v554_v3 = vld [vmem:[#allocation2 + $0x3e8] sm:$0xff] }
  0x53   : > { %885 = vmatprep.subr.mxu0 %v492_v15  ;;  %952 = vmatprep.subr.mxu1 %v530_v16  ;;  %v462_v4 = vld [vmem:[#allocation2 + $0x108] sm:$0xff]  ;;  %v553_v5 = vld [vmem:[#allocation2 + $0x3e0] sm:$0xff]  ;;  %v536_v7 = vld [vmem:[#allocation2 + $0x358] sm:$0xff] }
  0x54   : > { %886 = vmatpush1.msra.mxu0 %v491_v17  ;;  %953 = vmatpush1.msra.mxu1 %v529_v18  ;;  %v461_v6 = vld [vmem:[#allocation2 + $0x100] sm:$0xff]  ;;  %v444_v8 = vld [vmem:[#allocation2 + $0x78] sm:$0xff]  ;;  %v535_v9 = vld [vmem:[#allocation2 + $0x350] sm:$0xff] }
  0x55   : > { %887 = vmatprep.subr.mxu0 %v474_v19  ;;  %954 = vmatprep.subr.mxu1 %v512_v20  ;;  %v443_v10 = vld [vmem:[#allocation2 + $0x70] sm:$0xff]  ;;  %v518_v11 = vld [vmem:[#allocation2 + $0x2c8] sm:$0xff]  ;;  %v517_v12 = vld [vmem:[#allocation2 + $0x2c0] sm:$0xff] }
  0x56   : > { %888 = vmatpush1.msra.mxu0 %v473_v21  ;;  %955 = vmatpush1.msra.mxu1 %v511_v22  ;;  %v500_v13 = vld [vmem:[#allocation2 + $0x238] sm:$0xff]  ;;  %v499_v14 = vld [vmem:[#allocation2 + $0x230] sm:$0xff]  ;;  %v482_v15 = vld [vmem:[#allocation2 + $0x1a8] sm:$0xff]  ;;  %v2386_v22 = vmov 0  }
  0x57   : > { %889 = vmatprep.subr.mxu0 %v456_v23  ;;  %925 = vmatprep.mubr.f32.mxu0 %v2385_v0  ;;  %v481_v16 = vld [vmem:[#allocation2 + $0x1a0] sm:$0xff]  ;;  %v464_v17 = vld [vmem:[#allocation2 + $0x118] sm:$0xff]  ;;  %v463_v18 = vld [vmem:[#allocation2 + $0x110] sm:$0xff] }
  0x58   : > { %890 = vmatpush1.msra.mxu0 %v455_v24  ;;  %956 = vmatprep.subr.mxu1 %v494_v25  ;;  %v446_v19 = vld [vmem:[#allocation2 + $0x88] sm:$0xff]  ;;  %v445_v20 = vld [vmem:[#allocation2 + $0x80] sm:$0xff] }
  0x59   : > { %891 = vmatprep.subr.mxu0 %v438_v26  ;;  %957 = vmatpush1.msra.mxu1 %v493_v27  ;;  %v1969_v21 = vld [vmem:[%s2686_s3] sm:$0xf] }
  0x5a   : > { %892 = vmatpush1.msra.mxu0 %v437_v28  ;;  %958 = vmatprep.subr.mxu1 %v476_v29  ;;  %v1977_v23 = vld [vmem:[%s2687_s4] sm:$0xf] }
  0x5b   : > { %2185 = vmatmul.mubr.msk.f32.vlgmr.msra.gmra.mxu0 %vm573_vm0, %v2526_v33  ;;  %1019 = vmatprep.subr.mxu0 %v568_v30  ;;  %v1216_v28 = vld [vmem:[%s2685_s2] sm:$0xf] }
  0x5c   : > { %1020 = vmatpush1.msra.mxu0 %v567_v31  ;;  %959 = vmatpush1.msra.mxu1 %v475_v32  ;;  %v2197_v31 = vld [vmem:[%s2685_s2 + $0x8] sm:$0xf] }
  0x5d   : > { %1021 = vmatprep.subr.mxu0 %v550_v34  ;;  %960 = vmatprep.subr.mxu1 %v458_v35  ;;  %v2201_v35 = vld [vmem:[%s2685_s2 + $0xc] sm:$0xf] }
  0x5e   : > { %1022 = vmatpush1.msra.mxu0 %v549_v36  ;;  %961 = vmatpush1.msra.mxu1 %v457_v37 }
  0x5f   : > { %1023 = vmatprep.subr.mxu0 %v532_v38  ;;  %962 = vmatprep.subr.mxu1 %v440_v39  ;;  %v2205_v38 = vld [vmem:[%s2685_s2 + $0x10] sm:$0xf] }
  0x60   : > { %1024 = vmatpush1.msra.mxu0 %v531_v40  ;;  %963 = vmatpush1.msra.mxu1 %v439_v41  ;;  %v2209_v41 = vld [vmem:[%s2685_s2 + $0x14] sm:$0xf] }
  0x61   : > { %1025 = vmatprep.subr.mxu0 %v514_v42  ;;  %996 = vmatprep.mubr.f32.mxu1 %v2385_v0 }
  0x62   : > { %1026 = vmatpush1.msra.mxu0 %v513_v43  ;;  %1090 = vmatprep.subr.mxu1 %v570_v44  ;;  %v2213_v44 = vld [vmem:[%s2685_s2 + $0x18] sm:$0xf] }
  0x63   : > { %2186 = vmatmul.mubr.msk.f32.vlgmr.msra.gmra.mxu1 %vm573_vm0, %v2526_v33  ;;  %1027 = vmatprep.subr.mxu0 %v496_v45 }
  0x64   : > { %1091 = vmatpush1.msra.mxu1 %v569_v46  ;;  %1028 = vmatpush1.msra.mxu0 %v495_v47  ;;  %v2217_v47 = vld [vmem:[%s2685_s2 + $0x1c] sm:$0xf] }
  0x65   : > { %1092 = vmatprep.subr.mxu1 %v552_v48  ;;  %1029 = vmatprep.subr.mxu0 %v478_v49 }
  0x66   : > { %1093 = vmatpush1.msra.mxu1 %v551_v50  ;;  %1030 = vmatpush1.msra.mxu0 %v477_v51  ;;  %v2221_v50 = vld [vmem:[%s2685_s2 + $0x20] sm:$0xf] }
  0x67   : > { %1094 = vmatprep.subr.mxu1 %v534_v52  ;;  %1031 = vmatprep.subr.mxu0 %v460_v53  ;;  %v2225_v51 = vld [vmem:[%s427_s29] ss:$0 sm:$0xff]  ;;  %s2078_s29 = scalar_lea.hbm %s2694_s11, %s2231_s15 }
  0x68   : > { %1095 = vmatpush1.msra.mxu1 %v533_v54  ;;  %1032 = vmatpush1.msra.mxu0 %v459_v55  ;;  %v2039_v54 = vld [vmem:[%s2692_s9] sm:$0xf] }
  0x69   : > { %1096 = vmatprep.subr.mxu1 %v516_v56  ;;  %1033 = vmatprep.subr.mxu0 %v442_v57  ;;  %v2040_v55 = vmul.f32 %v2225_v51, %v2039_v54 }
  0x6a   : > { %1097 = vmatpush1.msra.mxu1 %v515_v58  ;;  %1034 = vmatpush1.msra.mxu0 %v441_v59 }
  0x6b   : > { %1067 = vmatprep.mubr.f32.mxu0 %v2385_v0  ;;  %1098 = vmatprep.subr.mxu1 %v498_v60  ;;  %v2041_v56 = vsel %vm2033_vm3, %v2040_v55, 0.0 }
  0x6c   : > { %2187 = vmatmul.mubr.msk.f32.vlgmr.msra.gmra.mxu0 %vm573_vm0, %v2526_v33  ;;  %1099 = vmatpush1.msra.mxu1 %v497_v61 }
  0x6d   : > { %1161 = vmatprep.subr.mxu0 %v572_v62  ;;  %1100 = vmatprep.subr.mxu1 %v480_v63 }
  0x6e   : > { %1162 = vmatpush1.msra.mxu0 %v571_v1  ;;  %1101 = vmatpush1.msra.mxu1 %v479_v2 }
  0x6f   : > { %1163 = vmatprep.subr.mxu0 %v554_v3  ;;  %1102 = vmatprep.subr.mxu1 %v462_v4 }
  0x70   : > { %1164 = vmatpush1.msra.mxu0 %v553_v5  ;;  %1103 = vmatpush1.msra.mxu1 %v461_v6 }
  0x71   : > { %1165 = vmatprep.subr.mxu0 %v536_v7  ;;  %1104 = vmatprep.subr.mxu1 %v444_v8 }
  0x72   : > { %1166 = vmatpush1.msra.mxu0 %v535_v9  ;;  %1105 = vmatpush1.msra.mxu1 %v443_v10 }
  0x73   : > { %1138 = vmatprep.mubr.f32.mxu1 %v2385_v0  ;;  %1167 = vmatprep.subr.mxu0 %v518_v11 }
  0x74   : > { %2188 = vmatmul.mubr.msk.f32.vlgmr.msra.gmra.mxu1 %vm573_vm0, %v2526_v33  ;;  %1168 = vmatpush1.msra.mxu0 %v517_v12  ;;  %v1985_v12 = vlaneseq }
  0x75   : > { %1169 = vmatprep.subr.mxu0 %v500_v13  ;;  %1209 = vmatprep.mubr.f32.mxu0 %v2385_v0 }
  0x76   : > { %1170 = vmatpush1.msra.mxu0 %v499_v14  ;;  %1294 = vmatprep.mubr.f32.mxu1 %v2385_v0 }
  0x77   : > { %1171 = vmatprep.subr.mxu0 %v482_v15  ;;  %2286 = vset.pattern.permute.xlu0 %v2386_v22 }
  0x78   : > { %1172 = vmatpush1.msra.mxu0 %v481_v16  ;;  %2287 = vset.pattern.permute.xlu1 %v2386_v22 }
  0x79   : > { %1173 = vmatprep.subr.mxu0 %v464_v17  ;;  %1972 = vperm.xlu0 %2286, %v1969_v21   ;;  %v1986_v17 = vshrl.u32 %v1985_v12, 7 }
  0x7a   : > { %1174 = vmatpush1.msra.mxu0 %v463_v18 }
  0x7b   : > { %1175 = vmatprep.subr.mxu0 %v446_v19 }
  0x7c   : > { %1176 = vmatpush1.msra.mxu0 %v445_v20 }
  0x7d   : > { %2189 = vmatmul.mubr.msk.f32.vlgmr.msra.gmra.mxu0 %vm573_vm0, %v2526_v33  ;;  %1981 = vperm.xlu0 %2286, %v1977_v23   ;;  %v2190_v33 = vld [vmem:[%s2685_s2 + $0x4] sm:$0xf]  ;;  %v1987_v23 = vsub.s32 0, %v1986_v17 }
  0x7e   : > { %1624 = vmatprep.mubr.f32.mxu0 %v2385_v0 }
  0x9c   : > { %2042 = vadd.xlane.f32.xlu0 %v2041_v56 }
  0xf4   : > { %v1973_v19 = vpop.permute.xlu0 %1972 }
  0xfa   : > { %v643_v24 = vpop.f32.mrf.mxu0  ;;  %v714_v25 = vpop.f32.mrf.mxu1 }
  0xfc   : > { %v716_v26 = vpop.f32.mrf.mxu1  ;;  %v645_v27 = vpop.f32.mrf.mxu0 }
  0xfd   : > { %2191 = vmatprep.subr.msk.mxu1 %vm1223_vm1, %v716_v26  ;;  %v1991_v26 = vsub.s32 1, %v1986_v17 }
  0xfe   : > { %2192 = vmatpush1.msk.msra.mxu1 %vm1223_vm1, %v714_v25 }
  0xff   : > { %2194 = vmatprep.subr.msk.mxu1 %vm1223_vm1, %v645_v27  ;;  %2193 = vmatmul.mubr.msk.f32.vlgmr.msra.gmra.mxu1 %vm1219_vm2, %v2190_v33 }
 0x100   : > { %2195 = vmatpush1.msk.msra.mxu1 %vm1223_vm1, %v643_v24  ;;  %1374 = vmatprep.mubr.f32.mxu1 %v2385_v0  ;;  %v1978_v24 = vld [vmem:[%s424_s25] sm:$0x3] }
 0x103   : > { %2196 = vmatmul.mubr.msk.f32.vlgmr.msra.gmra.mxu1 %vm1219_vm2, %v1216_v28  ;;  %v1988_v28 = vrot.slane %v1978_v24, %v1987_v23 }
 0x104   : > { %1456 = vmatprep.mubr.f32.mxu1 %v2385_v0 }
 0x10b   : > { %v785_v29 = vpop.f32.mrf.mxu0 }
 0x10d   : > { %v787_v30 = vpop.f32.mrf.mxu0 }
 0x10e   : > { %2198 = vmatprep.subr.msk.mxu1 %vm1223_vm1, %v787_v30  ;;  %v1982_v30 = vpop.permute.xlu0 %1981 }
 0x10f   : > { %2199 = vmatpush1.msk.msra.mxu1 %vm1223_vm1, %v785_v29  ;;  %v856_v32 = vpop.f32.mrf.mxu1 }
 0x110   : > { %2200 = vmatmul.mubr.msk.f32.vlgmr.msra.gmra.mxu1 %vm1219_vm2, %v2197_v31 }
 0x111   : > { %v858_v34 = vpop.f32.mrf.mxu1  ;;  %1540 = vmatprep.mubr.f32.mxu1 %v2385_v0 }
 0x112   : > { %2202 = vmatprep.subr.msk.mxu1 %vm1223_vm1, %v858_v34  ;;  %v1992_v34 = vrot.slane %v1978_v24, %v1991_v26 }
 0x113   : > { %2203 = vmatpush1.msk.msra.mxu1 %vm1223_vm1, %v856_v32 }
 0x114   : > { %2204 = vmatmul.mubr.msk.f32.vlgmr.msra.gmra.mxu1 %vm1219_vm2, %v2201_v35 }
 0x115   : > { %1708 = vmatprep.mubr.f32.mxu1 %v2385_v0 }
 0x11b   : > { %v927_v36 = vpop.f32.mrf.mxu0 }
 0x11d   : > { %v929_v37 = vpop.f32.mrf.mxu0 }
 0x11e   : > { %2206 = vmatprep.subr.msk.mxu0 %vm1223_vm1, %v929_v37  ;;  %v1995_v37 = vmul.f32 %v1988_v28, %v1982_v30 }
 0x11f   : > { %2207 = vmatpush1.msk.msra.mxu0 %vm1223_vm1, %v927_v36 }
 0x120   : > { %2208 = vmatmul.mubr.msk.f32.vlgmr.msra.gmra.mxu0 %vm1219_vm2, %v2205_v38 }
 0x121   : > { %1792 = vmatprep.mubr.f32.mxu0 %v2385_v0 }
 0x123   : > { %v998_v39 = vpop.f32.mrf.mxu1 }
 0x125   : > { %v1000_v40 = vpop.f32.mrf.mxu1 }
 0x126   : > { %2210 = vmatprep.subr.msk.mxu1 %vm1223_vm1, %v1000_v40 }
 0x127   : > { %2211 = vmatpush1.msk.msra.mxu1 %vm1223_vm1, %v998_v39  ;;  %v1996_v39 = vmul.f32 %v1992_v34, %v1982_v30 }
 0x128   : > { %2212 = vmatmul.mubr.msk.f32.vlgmr.msra.gmra.mxu1 %vm1219_vm2, %v2209_v41 }
 0x129   : > { %1876 = vmatprep.mubr.f32.mxu1 %v2385_v0 }
 0x12c   : > { %v1069_v42 = vpop.f32.mrf.mxu0 }
 0x12e   : > { %v1071_v43 = vpop.f32.mrf.mxu0 }
 0x12f   : > { %2214 = vmatprep.subr.msk.mxu0 %vm1223_vm1, %v1071_v43 }
 0x130   : > { %2215 = vmatpush1.msk.msra.mxu0 %vm1223_vm1, %v1069_v42 }
 0x131   : > { %2216 = vmatmul.mubr.msk.f32.vlgmr.msra.gmra.mxu0 %vm1219_vm2, %v2213_v44 }
 0x132   : > { %1960 = vmatprep.mubr.f32.mxu0 %v2385_v0  ;;  %v2025_v0 = vld [vmem:[%s2690_s7] sm:$0xf] }
 0x133   : > { %v2032_v52 = vmul.f32 %v2225_v51, %v2025_v0  ;;  %v2037_v0 = vld [vmem:[%s2691_s8] sm:$0xf] }
 0x134   : > { %v1140_v45 = vpop.f32.mrf.mxu1 }
 0x135   : > { %v2629_v53 = vsel %vm2033_vm3, %v2032_v52, 0.0 }
 0x136   : > { %v1142_v46 = vpop.f32.mrf.mxu1 }
 0x137   : > { %2218 = vmatprep.subr.msk.mxu1 %vm1223_vm1, %v1142_v46 }
 0x138   : > { %2219 = vmatpush1.msk.msra.mxu1 %vm1223_vm1, %v1140_v45 }
 0x139   : > { %2220 = vmatmul.mubr.msk.f32.vlgmr.msra.gmra.mxu1 %vm1219_vm2, %v2217_v47 }
 0x13d   : > { %v1211_v48 = vpop.f32.mrf.mxu0 }
 0x13f   : > { %v1213_v49 = vpop.f32.mrf.mxu0 }
 0x140   : > { %2222 = vmatprep.subr.msk.mxu0 %vm1223_vm1, %v1213_v49 }
 0x141   : > { %2223 = vmatpush1.msk.msra.mxu0 %vm1223_vm1, %v1211_v48 }
 0x142   : > { %2224 = vmatmul.mubr.msk.f32.vlgmr.msra.gmra.mxu0 %vm1219_vm2, %v2221_v50 }
 0x1bf   : > { %v1296_v57 = vpop.f32.mrf.mxu1 }
 0x1c1   : > { %v1298_v58 = vpop.f32.mrf.mxu1 }
 0x1c3   : > { %v1376_v59 = vpop.f32.mrf.mxu1 }
 0x1c4   : > { %v1377_v63 = vadd.f32 %v1376_v59, %v1296_v57 }
 0x1c5   : > { %v1378_v60 = vpop.f32.mrf.mxu1 }
 0x1c6   : > { %v1379_v1 = vadd.f32 %v1378_v60, %v1298_v58 }
 0x1d0   : > { %v1458_v61 = vpop.f32.mrf.mxu1 }
 0x1d1   : > { %v1463_v3 = vadd.f32 %v1458_v61, %v1377_v63 }
 0x1d2   : > { %v1460_v62 = vpop.f32.mrf.mxu1 }
 0x1d3   : > { %v1464_v4 = vadd.f32 %v1460_v62, %v1379_v1  ;;  %v2043_v62 = vpop.xlane.xlu0 %2042 }
 0x1d4   : > { %v1542_v2 = vpop.f32.mrf.mxu1 }
 0x1d5   : > { %v1547_v7 = vadd.f32 %v1542_v2, %v1463_v3 }
 0x1d6   : > { %v1544_v5 = vpop.f32.mrf.mxu1 }
 0x1d7   : > { %v1548_v8 = vadd.f32 %v1544_v5, %v1464_v4 }
 0x1e0   : > { %v1626_v6 = vpop.f32.mrf.mxu0 }
 0x1e1   : > { %v1631_v11 = vadd.f32 %v1626_v6, %v1547_v7 }
 0x1e2   : > { %v1628_v9 = vpop.f32.mrf.mxu0 }
 0x1e3   : > { %v1632_v13 = vadd.f32 %v1628_v9, %v1548_v8 }
 0x1e8   : > { %v1710_v10 = vpop.f32.mrf.mxu1 }
 0x1e9   : > { %v1715_v16 = vadd.f32 %v1710_v10, %v1631_v11 }
 0x1ea   : > { %v1712_v14 = vpop.f32.mrf.mxu1 }
 0x1eb   : > { %v1716_v18 = vadd.f32 %v1712_v14, %v1632_v13 }
 0x1f1   : > { %v1794_v15 = vpop.f32.mrf.mxu0 }
 0x1f2   : > { %v1799_v22 = vadd.f32 %v1794_v15, %v1715_v16 }
 0x1f3   : > { %v1796_v20 = vpop.f32.mrf.mxu0 }
 0x1f4   : > { %v1800_v25 = vadd.f32 %v1796_v20, %v1716_v18 }
 0x1f9   : > { %v1878_v21 = vpop.f32.mrf.mxu1 }
 0x1fa   : > { %v1883_v27 = vadd.f32 %v1878_v21, %v1799_v22 }
 0x1fb   : > { %v1880_v33 = vpop.f32.mrf.mxu1 }
 0x1fc   : > { %v1884_v31 = vadd.f32 %v1880_v33, %v1800_v25 }
 0x202   : > { %v1962_v29 = vpop.f32.mrf.mxu0 }
 0x203   : > { %v1967_v32 = vadd.f32 %v1962_v29, %v1883_v27 }
 0x204   : > { %v1964_v35 = vpop.f32.mrf.mxu0 }
 0x205   : > { %v1975_v36 = vadd.f32 %v1973_v19, %v1967_v32  ;;  %v1968_v38 = vadd.f32 %v1964_v35, %v1884_v31 }
 0x207   : > { %v1997_v40 = vadd.f32 %v1995_v37, %v1975_v36  ;;  %v1976_v41 = vadd.f32 %v1973_v19, %v1968_v38 }
 0x209   : > { %v1998_v42 = vadd.f32 %v1996_v39, %v1976_v41  ;;  %v1999_v43 = vmul.f32 0.2, %v1997_v40 }
 0x20b   : > { %v2000_v44 = vmul.f32 0.2, %v1998_v42  ;;  %v2001_v45 = vmax.f32 %v1997_v40, %v1999_v43 }
 0x20d   : > { %v2002_v46 = vmax.f32 %v1998_v42, %v2000_v44  ;;  %v2003_v47 = vsel %vm1223_vm1, %v2001_v45, 0.0 }
 0x20f   : > { %v2004_v48 = vsel %vm1223_vm1, %v2002_v46, 0.0 }
 0x210   : > { %v2005_v49 = vadd.f32 %v2004_v48, %v2003_v47 }
 0x212   : > { %2006 = vadd.xlane.f32.xlu1 %v2005_v49 }
 0x216   : > { %2035 = vadd.xlane.f32.xlu1 %v2629_v53  ;;  %v2044_v53 = vld [vmem:[%s2693_s10] sm:$0xf] }
 0x217   : > { %v2045_v63 = vadd.f32 %v2044_v53, %v2043_v62 }
 0x29b   : > { %v2007_v50 = vpop.xlane.xlu1 %2006 }
 0x29c   : > { %v2009_v54 = vmul.f32 0.00390625, %v2007_v50 }
 0x29e   : > { %v2010_v55 = vsub.f32 %v2001_v45, %v2009_v54  ;;  %v2011_v56 = vsub.f32 %v2002_v46, %v2009_v54 }
 0x29f   : > { %v2036_v51 = vpop.xlane.xlu1 %2035 }
 0x2a0   : > { %v2038_v52 = vadd.f32 %v2037_v0, %v2036_v51  ;;  %v2012_v57 = vmul.f32 %v2010_v55, %v2010_v55  ;;  %v2013_v58 = vmul.f32 %v2011_v56, %v2011_v56 }
 0x2a2   : > { %2048 = vperm.xlu1 %2287, %v2038_v52   ;;  %v2014_v59 = vsel %vm1223_vm1, %v2012_v57, 0.0  ;;  %v2015_v60 = vsel %vm1223_vm1, %v2013_v58, 0.0 }
 0x2a3   : > { %v2016_v61 = vadd.f32 %v2015_v60, %v2014_v59 }
 0x2c6   : > { %2017 = vadd.xlane.f32.xlu1 %v2016_v61 }
 0x2d7   : > { %2055 = vperm.xlu1 %2287, %v2045_v63  }
 0x31d   : > { %v2049_v1 = vpop.permute.xlu1 %2048 }
 0x34f   : > { %v2018_v2 = vpop.xlane.xlu1 %2017 }
 0x350   : > { %v2019_v3 = vmul.f32 0.00390625, %v2018_v2 }
 0x352   : > { %v2020_v4 = vadd.f32 1e-05, %v2019_v3 }
 0x353   : > { %v2056_v10 = vpop.permute.xlu1 %2055 }
 0x354   : > { %2288 = vrsqrt.f32 %v2020_v4 }
 0x361   : > { %v2289_v5 = vpop.eup %2288 }
 0x362   : > { %v2022_v6 = vmul.f32 %v2289_v5, %v2010_v55  ;;  %v2023_v7 = vmul.f32 %v2289_v5, %v2011_v56 }
 0x364   : > { %v2051_v8 = vmul.f32 %v2049_v1, %v2022_v6  ;;  %v2052_v9 = vmul.f32 %v2049_v1, %v2023_v7 }
 0x366   : > { %v2058_v11 = vadd.f32 %v2056_v10, %v2051_v8  ;;  %v2059_v12 = vadd.f32 %v2056_v10, %v2052_v9 }
 0x368   : > { %v2062_v13 = vcombine.low %v2058_v11, %v2059_v12 }
 0x36a   : > { %2064 = vst [vmem:[%s416_s16] sm:$0xff] %v2062_v13 }
 0x36b   : > { %2329 = shalt.err (!%p2326_p0)
}
 0x36c   : > { %s2330_s14 = scalar_lea.hbm %s2078_s29, 128  ;;  %s2334_s16 = scalar_lea.hbm %s2694_s11, 256 }
 0x36d   : > { %p2331_p1 = scmp.ne.s32.totalorder %s2078_s29, %s2330_s14  ;;  %p2335_p4 = scmp.lt.s32.totalorder %s2078_s29, %s2694_s11 }
 0x36e   : > { %p2336_p7 = scmp.lt.s32.totalorder %s2334_s16, %s2330_s14 }
 0x36f   : > { %p2332_p2 = pnand %p2331_p1, %p2486_p5 }
 0x370   : > { %p2337_p6 = por %p2336_p7, %p2335_p4 }
 0x371   : > { %p2333_p3 = pneg %p2332_p2 }
 0x373   : > { %p2338_p8 = pnand %p2337_p6, %p2333_p3 }
 0x375   : > { %2341 = shalt.err (!%p2338_p8)
}
 0x376   : > { %2236 = dma.vmem_to_hbm [thread:$0]  (%p2486_p5), %s2081_s22, 128, %s2078_s29, %s2066_s30  }
 0x377 PF: > { %p2248_p9 = scmp.ge.s32.totalorder %s2380_s20, 2  ;;  %s2092_s0 = sand.u32 1, %s2368_s17  }
 0x378   : > { %p2702_p10 = scmp.ne.s32.totalorder %s2698_s28, 0  ;;  %s2093_s1 = scalar_lea.sflag [#allocation4], %s2092_s0 }
 0x37a   : > { %p2243_p11 = pnand %p2248_p9, %p2702_p10 }
 0x37c   : > { %p2244_p12 = pneg %p2243_p11 }
 0x37e   : > { %2363 = dma.done.wait (%p2244_p12), %s2093_s1, 128  }
 0x37f   : > { %2365 = vsyncadd (%p2244_p12), %s2093_s1, 4294967168  ;;  %p22_p13 = scmp.ge.s32.totalorder %s2473_s23, 4   ;;  %s2703_s17 = smov %s2372_s18 }
 0x380   : > { %s2704_s18 = smov %s2376_s19  ;;  %s2705_s19 = smov %s2484_s26 }
 0x381   : > { %s2706_s20 = smov %s2473_s23  ;;  %24 = sbr.rel (!%p22_p13) target bundleno = 7 (0x7), region = 118 }
 0x386   :  { %2098 = vsyncpa [#allocation3], 1 }
 0x387   :  { %2100 = vsyncpa [#allocation3 + $0x1], 1 }
 0x388   :  { %2101 = vsyncpa [#allocation4], 1 }
 0x389   :  { %2103 = vsyncpa [#allocation4 + $0x1], 1 }

</bundles_post_ra>
